<compile_context>
chip_gen: v7x
topology: tpu7x:2x2x1
jax: 0.10.0
libtpu: 0.0.40
codegen_flags: <defaults>
</compile_context>

<pallas_src>
import functools

import jax
import jax.numpy as jnp
from jax.experimental import pallas as pl
from jax.experimental.pallas import tpu as pltpu


def _sigmoid(z):
    # sigmoid(z) = 0.5 * (tanh(z/2) + 1): single EUP op + cheap VPU mul/add.
    return 0.5 * jnp.tanh(0.5 * z) + 0.5


def autoencoder_kernel(x_ref, wg_ref, bg_ref, wh_ref, bh_ref, o_ref):
    # hidden = sigmoid(x @ Wg + bg)                     (TB, Kp)
    x = x_ref[...].astype(jnp.bfloat16)
    z1 = jnp.dot(x, wg_ref[...], preferred_element_type=jnp.float32) + bg_ref[...]
    hidden = _sigmoid(z1)
    # out = sigmoid(hidden @ Wh + bh)                   (TB, Q)
    z2 = jnp.dot(hidden.astype(jnp.bfloat16), wh_ref[...],
                 preferred_element_type=jnp.float32) + bh_ref[...]
    o_ref[...] = _sigmoid(z2).astype(o_ref.dtype)


def prepare_params(g_w, g_b, h_w, h_b):
    """One-time prep (NOT per forward call): transpose PyTorch-layout weights
    (out, in) -> (in, out), zero-pad k up to a multiple of 128, cast weights
    to bf16.  Biases stay f32 (added after the f32-accumulated matmul)."""
    k, q = g_w.shape                       # g.weight is (k, num_question)
    k_pad = pl.cdiv(k, 128) * 128
    wg_t = jnp.zeros((q, k_pad), jnp.bfloat16).at[:, :k].set(
        g_w.T.astype(jnp.bfloat16))
    bg = jnp.zeros((1, k_pad), jnp.float32).at[:, :k].set(
        g_b.astype(jnp.float32))
    wh_t = jnp.zeros((k_pad, q), jnp.bfloat16).at[:k, :].set(
        h_w.T.astype(jnp.bfloat16))
    bh = h_b.reshape(1, q).astype(jnp.float32)
    return wg_t, bg, wh_t, bh


@functools.partial(jax.jit, static_argnames=("tb", "out_dtype"))
def autoencoder_forward(x, wg_t, bg, wh_t, bh, *, tb=1024, out_dtype=None):
    """x: (B, Q) f32 (or bf16 from the producer); wg_t: (Q, Kp) bf16;
       bg: (1, Kp) f32; wh_t: (Kp, Q) bf16; bh: (1, Q) f32.
       Returns (B, Q) in `out_dtype` (defaults to x.dtype)."""
    b, q = x.shape
    kp = wg_t.shape[1]
    out_dtype = x.dtype if out_dtype is None else out_dtype

    # Batch tile: always a multiple of 8; capped at ceil(B/2) rounded up to a
    # multiple of 8 so the grid has >= 2 steps whenever B >= 16 (shards across
    # v7x's two TCs); otherwise use the requested (large) tile.
    two_step_cap = pl.cdiv(pl.cdiv(b, 2), 8) * 8
    tb_eff = max(8, min((tb // 8) * 8, two_step_cap))
    grid = (pl.cdiv(b, tb_eff),)           # ragged last block handled by Pallas

    cost = pl.CostEstimate(
        flops=4 * b * q * kp,                       # two matmuls
        transcendentals=b * (kp + q),               # one tanh per activation
        bytes_accessed=int(
            x.size * x.dtype.itemsize
            + wg_t.size * wg_t.dtype.itemsize
            + wh_t.size * wh_t.dtype.itemsize
            + bg.size * bg.dtype.itemsize
            + bh.size * bh.dtype.itemsize
            + b * q * jnp.dtype(out_dtype).itemsize),
    )

    return pl.pallas_call(
        autoencoder_kernel,
        out_shape=jax.ShapeDtypeStruct((b, q), out_dtype),
        grid=grid,
        in_specs=[
            pl.BlockSpec((tb_eff, q), lambda i: (i, 0)),  # x: tiled over batch
            pl.BlockSpec((q, kp), lambda i: (0, 0)),      # Wg: VMEM-resident
            pl.BlockSpec((1, kp), lambda i: (0, 0)),      # bg
            pl.BlockSpec((kp, q), lambda i: (0, 0)),      # Wh: VMEM-resident
            pl.BlockSpec((1, q), lambda i: (0, 0)),       # bh
        ],
        out_specs=pl.BlockSpec((tb_eff, q), lambda i: (i, 0)),
        compiler_params=pltpu.CompilerParams(
            dimension_semantics=("parallel",)),
        cost_estimate=cost,
    )(x, wg_t, bg, wh_t, bh)


def init_linear_params(key, in_features, out_features):
    """Mimic PyTorch nn.Linear default init: U(-1/sqrt(in), 1/sqrt(in)),
    weight stored as (out, in)."""
    kw, kb = jax.random.split(key)
    bound = 1.0 / jnp.sqrt(jnp.float32(in_features))
    w = jax.random.uniform(kw, (out_features, in_features),
                           jnp.float32, -bound, bound)
    b = jax.random.uniform(kb, (out_features,), jnp.float32, -bound, bound)
    return w, b


def reference_forward(x, g_w, g_b, h_w, h_b):
    """f32 reference using the same bf16 quantization of x / weights /
    hidden activation as the kernel (accumulation in f32)."""
    q16 = lambda a: a.astype(jnp.bfloat16).astype(jnp.float32)
    hidden = jax.nn.sigmoid(q16(x) @ q16(g_w).T + g_b)
    out = jax.nn.sigmoid(q16(hidden) @ q16(h_w).T + h_b)
    return out


if __name__ == "__main__":
    batch = 300          # NOT a multiple of the tile -> exercises the ragged
                         # last block path (no wrapper-side jnp.pad of x)
    num_question = 256
    k = 100              # module default; padded to 128 inside prepare_params

    root = jax.random.PRNGKey(0)
    kx, kg, kh = jax.random.split(root, 3)

    # Deterministic synthetic "user vectors" in [0, 1] (like imputed ratings).
    x = jax.random.uniform(kx, (batch, num_question), jnp.float32)

    g_w, g_b = init_linear_params(kg, num_question, k)   # g: Q -> k
    h_w, h_b = init_linear_params(kh, k, num_question)   # h: k -> Q

    # One-time parameter prep (transpose + pad + bf16 cast), hoisted out of
    # the per-call path.
    wg_t, bg, wh_t, bh = prepare_params(g_w, g_b, h_w, h_b)

    # tb default (1024) is capped to a 2-step grid for this small batch.
    out = autoencoder_forward(x, wg_t, bg, wh_t, bh)
    out = jax.block_until_ready(out)

    ref = reference_forward(x, g_w, g_b, h_w, h_b)
    assert out.shape == (batch, num_question)
    max_err = float(jnp.max(jnp.abs(out - ref)))
    assert max_err < 1e-2, f"mismatch vs reference: max |err| = {max_err}"

    print("KERNEL_OK")
</pallas_src>

<mosaic_0001>
module attributes {stable_mosaic.version = 11 : i64} {
  func.func @autoencoder_kernel(%arg0: i32, %arg1: memref<152x256xf32, #tpu.memory_space<vmem>>, %arg2: memref<256x128xbf16, #tpu.memory_space<vmem>>, %arg3: memref<1x128xf32, #tpu.memory_space<vmem>>, %arg4: memref<128x256xbf16, #tpu.memory_space<vmem>>, %arg5: memref<1x256xf32, #tpu.memory_space<vmem>>, %arg6: memref<152x256xf32, #tpu.memory_space<vmem>>) attributes {dimension_semantics = [#tpu.dimension_semantics<parallel>], iteration_bounds = array<i64: 2>, scalar_prefetch = 0 : i64, scratch_operands = 0 : i64, tpu.core_type = #tpu.core_type<tc>, window_params = [{transform_indices = @transform_0, window_bounds = array<i64: 152, 256>}, {pipeline_mode = #tpu.pipeline_mode<synchronous>, transform_indices = @transform_1, window_bounds = array<i64: 256, 128>}, {pipeline_mode = #tpu.pipeline_mode<synchronous>, transform_indices = @transform_2, window_bounds = array<i64: 1, 128>}, {pipeline_mode = #tpu.pipeline_mode<synchronous>, transform_indices = @transform_3, window_bounds = array<i64: 128, 256>}, {pipeline_mode = #tpu.pipeline_mode<synchronous>, transform_indices = @transform_4, window_bounds = array<i64: 1, 256>}, {transform_indices = @transform_5, window_bounds = array<i64: 152, 256>}]} {
    %c0 = arith.constant 0 : index
    %c0_0 = arith.constant 0 : index
    %0 = vector.load %arg1[%c0, %c0_0] : memref<152x256xf32, #tpu.memory_space<vmem>>, vector<152x256xf32>
    %1 = arith.truncf %0 : vector<152x256xf32> to vector<152x256xbf16>
    %c0_1 = arith.constant 0 : index
    %c0_2 = arith.constant 0 : index
    %2 = vector.load %arg2[%c0_1, %c0_2] : memref<256x128xbf16, #tpu.memory_space<vmem>>, vector<256x128xbf16>
    %cst = arith.constant dense<0.000000e+00> : vector<152x128xf32>
    %3 = tpu.matmul %1, %2, %cst {dimension_numbers = #tpu.dot_dimension_numbers<[1], [0], [0], [1], [0, 0, 1, 1], [], []>} : vector<152x256xbf16>, vector<256x128xbf16>, vector<152x128xf32> -> vector<152x128xf32>
    %c0_3 = arith.constant 0 : index
    %c0_4 = arith.constant 0 : index
    %4 = vector.load %arg3[%c0_3, %c0_4] : memref<1x128xf32, #tpu.memory_space<vmem>>, vector<1x128xf32>
    %5 = vector.broadcast %4 : vector<1x128xf32> to vector<152x128xf32>
    %6 = arith.addf %3, %5 : vector<152x128xf32>
    %cst_5 = arith.constant 5.000000e-01 : f32
    %7 = vector.broadcast %cst_5 : f32 to vector<152x128xf32>
    %8 = arith.mulf %7, %6 : vector<152x128xf32>
    %9 = math.tanh %8 : vector<152x128xf32>
    %cst_6 = arith.constant 5.000000e-01 : f32
    %10 = vector.broadcast %cst_6 : f32 to vector<152x128xf32>
    %11 = arith.mulf %10, %9 : vector<152x128xf32>
    %cst_7 = arith.constant 5.000000e-01 : f32
    %12 = vector.broadcast %cst_7 : f32 to vector<152x128xf32>
    %13 = arith.addf %11, %12 : vector<152x128xf32>
    %14 = arith.truncf %13 : vector<152x128xf32> to vector<152x128xbf16>
    %c0_8 = arith.constant 0 : index
    %c0_9 = arith.constant 0 : index
    %15 = vector.load %arg4[%c0_8, %c0_9] : memref<128x256xbf16, #tpu.memory_space<vmem>>, vector<128x256xbf16>
    %cst_10 = arith.constant dense<0.000000e+00> : vector<152x256xf32>
    %16 = tpu.matmul %14, %15, %cst_10 {dimension_numbers = #tpu.dot_dimension_numbers<[1], [0], [0], [1], [0, 0, 1, 1], [], []>} : vector<152x128xbf16>, vector<128x256xbf16>, vector<152x256xf32> -> vector<152x256xf32>
    %c0_11 = arith.constant 0 : index
    %c0_12 = arith.constant 0 : index
    %17 = vector.load %arg5[%c0_11, %c0_12] : memref<1x256xf32, #tpu.memory_space<vmem>>, vector<1x256xf32>
    %18 = vector.broadcast %17 : vector<1x256xf32> to vector<152x256xf32>
    %19 = arith.addf %16, %18 : vector<152x256xf32>
    %cst_13 = arith.constant 5.000000e-01 : f32
    %20 = vector.broadcast %cst_13 : f32 to vector<152x256xf32>
    %21 = arith.mulf %20, %19 : vector<152x256xf32>
    %22 = math.tanh %21 : vector<152x256xf32>
    %cst_14 = arith.constant 5.000000e-01 : f32
    %23 = vector.broadcast %cst_14 : f32 to vector<152x256xf32>
    %24 = arith.mulf %23, %22 : vector<152x256xf32>
    %cst_15 = arith.constant 5.000000e-01 : f32
    %25 = vector.broadcast %cst_15 : f32 to vector<152x256xf32>
    %26 = arith.addf %24, %25 : vector<152x256xf32>
    %c0_16 = arith.constant 0 : index
    %c0_17 = arith.constant 0 : index
    %27 = vector.load %arg6[%c0_16, %c0_17] : memref<152x256xf32, #tpu.memory_space<vmem>>, vector<152x256xf32>
    tpu.vector_store %arg6[%c0_16, %c0_17], %26 {strides = array<i32>} : memref<152x256xf32, #tpu.memory_space<vmem>>, vector<152x256xf32>,
    return
  }
  func.func @transform_0(%arg0: i32) -> (i32, i32) {
    %c0_i32 = arith.constant 0 : i32
    %c0_i32_0 = arith.constant 0 : i32
    return %arg0, %c0_i32 : i32, i32
  }
  func.func @transform_1(%arg0: i32) -> (i32, i32) {
    %c0_i32 = arith.constant 0 : i32
    %c0_i32_0 = arith.constant 0 : i32
    %c0_i32_1 = arith.constant 0 : i32
    return %c0_i32, %c0_i32_0 : i32, i32
  }
  func.func @transform_2(%arg0: i32) -> (i32, i32) {
    %c0_i32 = arith.constant 0 : i32
    %c0_i32_0 = arith.constant 0 : i32
    %c0_i32_1 = arith.constant 0 : i32
    return %c0_i32, %c0_i32_0 : i32, i32
  }
  func.func @transform_3(%arg0: i32) -> (i32, i32) {
    %c0_i32 = arith.constant 0 : i32
    %c0_i32_0 = arith.constant 0 : i32
    %c0_i32_1 = arith.constant 0 : i32
    return %c0_i32, %c0_i32_0 : i32, i32
  }
  func.func @transform_4(%arg0: i32) -> (i32, i32) {
    %c0_i32 = arith.constant 0 : i32
    %c0_i32_0 = arith.constant 0 : i32
    %c0_i32_1 = arith.constant 0 : i32
    return %c0_i32, %c0_i32_0 : i32, i32
  }
  func.func @transform_5(%arg0: i32) -> (i32, i32) {
    %c0_i32 = arith.constant 0 : i32
    %c0_i32_0 = arith.constant 0 : i32
    return %arg0, %c0_i32 : i32, i32
  }
}

</mosaic_0001>

<bundles_post_ra>
// kernel: autoencoder_forward.1
= control target key start
LH: loop header
LB: loop body
LE: loop exit
PB: predicated region body
PF: predicated region fallthrough
CT: control target
= control target key end

     0   :  { %10 = vsyncpa [#allocation3], 0  ;;  %s2163_s0 = inlined_call_operand.hbm [shape: f32[300,256], index: 0, kind: input, shape index: {}]   ;;  %s2164_s1 = inlined_call_operand.hbm [shape: bf16[256,128], index: 1, kind: input, shape index: {}]   ;;  %s2165_s2 = inlined_call_operand.vmem [shape: f32[1,128], index: 2, kind: input, shape index: {}]   ;;  %s2166_s3 = inlined_call_operand.hbm [shape: bf16[128,256], index: 3, kind: input, shape index: {}]   ;;  %s2167_s4 = inlined_call_operand.vmem [shape: f32[1,256], index: 4, kind: input, shape index: {}]   ;;  %s2168_s5 = inlined_call_operand.hbm [shape: f32[300,256], index: 5, kind: output, shape index: {}]  }
   0x1   :  { %12 = vsyncpa [#allocation3 + $0x1], 0 }
   0x2   :  { %13 = vsyncpa [#allocation6], 0 }
   0x3   :  { %14 = vsyncpa [#allocation4], 0 }
   0x4   :  { %16 = vsyncpa [#allocation4 + $0x1], 0  ;;  %s1765_s18 = smov 0   ;;  %s1767_s19 = smov 0  }
   0x5   :  { %s1769_s20 = smov 0   ;;  %s1771_s21 = smov 0  }
   0x6 LB: > { %s1786_s22 = sadd.s32 4294967295, %s1720_s21   ;;  %s1203_s23 = sadd.s32 4294967294, %s1720_s21   ;;  %s1720_s21 = sphi %s1771_s21, %s2188_s21   ;;  %s1716_s20 = sphi %s1769_s20, %s2187_s20   ;;  %s1712_s19 = sphi %s1767_s19, %s2186_s19   ;;  %s1708_s18 = sphi %s1765_s18, %s2185_s18  }
   0x7   : > { %p42_p0 = scmp.ne.s32.totalorder %s1712_s19, %s1708_s18  ;;  %p2169_p1 = scmp.eq.s32.totalorder %s1786_s22, 0 }
   0x8   : > { %p156_p3 = scmp.eq.s32.totalorder %s1203_s23, 1  ;;  %p1204_p5 = scmp.ge.s32.totalorder %s1720_s21, 1 }
   0x9   : > { %p1795_p4 = por %p2169_p1, %p42_p0  ;;  %p163_p7 = scmp.lt.s32.totalorder %s1720_s21, 3 }
   0xa   : > { %p1800_p6 = por %p156_p3, %p42_p0  ;;  %s1722_s27 = smov [#allocation5]  }
   0xb   : > { %s2172_s24 = scalar_select %p1795_p4, 1, 0 }
   0xc   : > { %s2173_s25 = scalar_select %p1800_p6, 1, 0 }
   0xd   : > { %p1805_p8 = pnand %p1204_p5, %p163_p7  ;;  %s175_s28 = sshll.u32 %s1722_s27, 4  ;;  %s1809_s28 = int_to_ptr.vmem [resolvable:$true] %s175_s28 }
   0xe   : > { %s1723_s30 = smov [#allocation7]   ;;  %s1564_s9 = scalar_lea.hbm %s2164_s1, 2048 }
   0xf   : > { %p1346_p9 = pneg %p1805_p8  ;;  %s191_s6 = sshll.u32 %s1723_s30, 4  ;;  %s1820_s6 = int_to_ptr.vmem [resolvable:$true] %s191_s6 }
  0x10   : > { %p1565_p12 = scmp.ne.s32.totalorder %s2164_s1, %s1564_s9  ;;  %p1571_p5 = scmp.lt.u32.totalorder %s1564_s9, %s2164_s1 }
  0x11   : > { %p1816_p11 = pnand %p1346_p9, %p2169_p1 }
  0x13   : > { %p1566_p13 = pneg %p1816_p11 }
  0x15   : > { %p1567_p0 = pnand %p1566_p13, %p1565_p12 }
  0x17   : > { %p1568_p3 = pneg %p1567_p0 }
  0x19   : > { %p1573_p7 = pnand %p1571_p5, %p1568_p3 }
  0x1b   : > { %1576 = shalt.err (!%p1573_p7)
}
  0x1c   : > { %s1577_s14 = scalar_lea.vmem %s1809_s28, 2048  ;;  %p1585_p2 = scmp.lt.s32.totalorder %s1809_s28, %s1809_s28 }
  0x1d   : > { %p1578_p9 = scmp.ne.s32.totalorder %s1809_s28, %s1577_s14  ;;  %p1586_p12 = scmp.lt.s32.totalorder %s1577_s14, %s1577_s14 }
  0x1f   : > { %p1580_p10 = pnand %p1578_p9, %p1566_p13  ;;  %p1587_p0 = por %p1586_p12, %p1585_p2 }
  0x21   : > { %p1581_p1 = pneg %p1580_p10 }
  0x23   : > { %p1588_p6 = pnand %p1587_p0, %p1581_p1 }
  0x25   : > { %1591 = shalt.err (!%p1588_p6)
}
  0x26   : > { %s1724_s15 = smov 64   ;;  %s1725_s16 = smov 4  }
  0x27   : > { %1349 = dma.hbm_to_vmem [thread:$0]  (!%p1816_p11), %s2164_s1, 2048, %s1809_s28, [#allocation6], %s1724_s15, %s1724_s15, %s1725_s16  }
  0x28   : > { %s1592_s7 = scalar_lea.hbm %s2166_s3, 2048 }
  0x29   : > { %p1593_p2 = scmp.ne.s32.totalorder %s2166_s3, %s1592_s7  ;;  %p1599_p10 = scmp.lt.u32.totalorder %s1592_s7, %s2166_s3 }
  0x2b   : > { %p1595_p1 = pnand %p1593_p2, %p1566_p13 }
  0x2d   : > { %p1596_p6 = pneg %p1595_p1 }
  0x2f   : > { %p1601_p3 = pnand %p1599_p10, %p1596_p6 }
  0x31   : > { %1604 = shalt.err (!%p1601_p3)
}
  0x32   : > { %s1605_s28 = scalar_lea.vmem %s1820_s6, 2048  ;;  %p1613_p12 = scmp.lt.s32.totalorder %s1820_s6, %s1820_s6 }
  0x33   : > { %p1606_p5 = scmp.ne.s32.totalorder %s1820_s6, %s1605_s28  ;;  %p1614_p0 = scmp.lt.s32.totalorder %s1605_s28, %s1605_s28 }
  0x35   : > { %p1608_p7 = pnand %p1606_p5, %p1566_p13  ;;  %p1615_p2 = por %p1614_p0, %p1613_p12 }
  0x37   : > { %p1609_p9 = pneg %p1608_p7 }
  0x39   : > { %p1616_p1 = pnand %p1615_p2, %p1609_p9 }
  0x3b   : > { %1619 = shalt.err (!%p1616_p1)
}
  0x3c   : > { %s1726_s12 = smov 128   ;;  %s1727_s13 = smov 8  }
  0x3d   : > { %1352 = dma.hbm_to_vmem [thread:$0]  (!%p1816_p11), %s2166_s3, 2048, %s1820_s6, [#allocation6], %s1726_s12, %s1726_s12, %s1727_s13  }
  0x3e   : > { %s1875_s16 = sadd.s32 1, %s1720_s21   ;;  %s29_s23 = sadd.s32 1, %s1716_s20 }
  0x3f   : > { %s26_s17 = ssub.s32 %s1720_s21, %s1875_s16  ;;  %p36_p6 = scmp.ne.s32.totalorder %s1716_s20, %s1712_s19 }
  0x40   : > { %p27_p13 = scmp.eq.s32.totalorder %s26_s17, 0  ;;  %p37_p10 = scmp.eq.s32.totalorder %s1720_s21, 0 }
  0x41   : > { %p2176_p5 = scmp.eq.s32.totalorder %s1786_s22, 1  ;;  %p1363_p9 = scmp.lt.s32.totalorder %s1720_s21, 2 }
  0x42   : > { %s1884_s27 = scalar_select %p27_p13, %s1716_s20, %s29_s23  }
  0x43   : > { %p38_p3 = por %p37_p10, %p36_p6  ;;  %p1888_p7 = por %p2176_p5, %p36_p6 }
  0x44   : > { %s208_s29 = sand.u32 1, %s1716_s20   ;;  %s1254_s6 = smul.u32 4864, %s1720_s21 }
  0x45   : > { %s2177_s30 = scalar_select %p1888_p7, 1, 0 }
  0x46   : > { %s1332_s7 = smul.u32 304, %s208_s29  ;;  %p1895_p11 = pnand %p1363_p9, %p38_p3 }
  0x47   : > { %s1902_s11 = scalar_lea.hbm %s2163_s0, %s1254_s6  ;;  %s1906_s13 = scalar_lea.sflag [#allocation3], %s208_s29 }
  0x48   : > { %s212_s28 = scalar_lea.vmem [#allocation2], %s1332_s7  ;;  %s1620_s14 = scalar_lea.hbm %s1902_s11, 4864 }
  0x49   : > { %s220_s12 = sshll.u32 %s212_s28, 4  ;;  %p1621_p12 = scmp.ne.s32.totalorder %s1902_s11, %s1620_s14  ;;  %s1904_s12 = int_to_ptr.vmem [resolvable:$true] %s220_s12 }
  0x4a   : > { %p1622_p0 = pneg %p1895_p11  ;;  %s1625_s23 = scalar_lea.hbm %s2163_s0, 9728 }
  0x4b   : > { %p1626_p13 = scmp.lt.u32.totalorder %s1902_s11, %s2163_s0  ;;  %p1627_p6 = scmp.lt.u32.totalorder %s1625_s23, %s1620_s14 }
  0x4c   : > { %p1623_p2 = pnand %p1622_p0, %p1621_p12  ;;  %p1629_p3 = scmp.lt.u32.totalorder %s1620_s14, %s1902_s11 }
  0x4d   : > { %p1628_p10 = por %p1627_p6, %p1626_p13 }
  0x4e   : > { %p1624_p1 = pneg %p1623_p2 }
  0x4f   : > { %p1630_p5 = por %p1629_p3, %p1628_p10 }
  0x51   : > { %p1631_p9 = pnand %p1630_p5, %p1624_p1 }
  0x53   : > { %1634 = shalt.err (!%p1631_p9)
}
  0x54   : > { %s1635_s29 = scalar_lea.vmem %s1904_s12, 4864  ;;  %s1728_s7 = smov [#allocation2]  }
  0x55   : > { %p1636_p12 = scmp.ne.s32.totalorder %s1904_s12, %s1635_s29  ;;  %s1640_s10 = sshll.u32 %s1728_s7, 4  ;;  %s1641_s10 = int_to_ptr.vmem [resolvable:$false] %s1640_s10 }
  0x56   : > { %s1642_s28 = scalar_lea.vmem %s1641_s10, 9728  ;;  %p1643_p4 = scmp.lt.s32.totalorder %s1904_s12, %s1641_s10 }
  0x57   : > { %p1638_p2 = pnand %p1636_p12, %p1622_p0  ;;  %p1644_p13 = scmp.lt.s32.totalorder %s1642_s28, %s1635_s29 }
  0x59   : > { %p1639_p7 = pneg %p1638_p2  ;;  %p1645_p6 = por %p1644_p13, %p1643_p4 }
  0x5b   : > { %p1646_p10 = pnand %p1645_p6, %p1639_p7 }
  0x5d   : > { %1649 = shalt.err (!%p1646_p10)
}
  0x5e   : > { %s1729_s14 = smov 256   ;;  %s1730_s15 = smov 16  }
  0x5f   : > { %1356 = dma.hbm_to_vmem [thread:$0]  (!%p1895_p11), %s1902_s11, 4864, %s1904_s12, %s1906_s13, %s1729_s14, %s1729_s14, %s1730_s15  }
  0x60   : > { %232 = sbr.rel (%p1805_p8) target bundleno = 697 (0x2b9), region = 40  ;;  %s1937_s17 = sand.u32 (!%p1805_p8), 1, %s1712_s19  }
  0x61   : > { %s1333_s23 = smul.u32 (!%p1805_p8), 304, %s1937_s17  ;;  %s235_s6 = scalar_lea.sflag (!%p1805_p8), [#allocation3], %s1937_s17 }
  0x62   : > { %p2179_p4 = scmp.ne.s32.totalorder (!%p1805_p8), %s2172_s24, 0 }
  0x63   : > { %s1943_s9 = scalar_lea.vmem (!%p1805_p8), [#allocation2], %s1333_s23 }
  0x67   : > { %1695 = dma.done.wait (%p2179_p4), %s235_s6, 4864  }
  0x68   : > { %1697 = vsyncadd (%p2179_p4), %s235_s6, 4294962432  ;;  %p2180_p7 = scmp.eq.s32.totalorder %s1786_s22, 0 }
  0x6a   : > { %1699 = dma.done.wait (%p2180_p7), [#allocation6], 4096   ;;  %p2181_p8 = pmov %p2180_p7 }
  0x6b   : > { %v1410_v0 = vld [vmem:[#allocation5 + $0x40] sm:$0xff]   ;;  %v1412_v2 = vld [vmem:[#allocation5 + $0x48] sm:$0xff]   ;;  %v1414_v4 = vld [vmem:[#allocation5 + $0x50] sm:$0xff]   ;;  %s2045_s12 = scalar_lea.vmem [#allocation8], %s1333_s23  ;;  %s1255_s13 = smul.u32 4864, %s1786_s22 }
  0x6c   : > { %1701 = vsyncadd (%p2181_p8), [#allocation6], 4294963200  ;;  %v1411_v1 = vld [vmem:[#allocation5] sm:$0xff]   ;;  %1256 = vmatprep.subr.bf16.mxu0 %v1410_v0  ;;  %v1413_v3 = vld [vmem:[#allocation5 + $0x8] sm:$0xff]   ;;  %s1111_s29 = sshll.u32 %s2045_s12, 4  ;;  %s1097_s22 = scalar_lea.sflag [#allocation4], %s1937_s17  ;;  %s2117_s29 = int_to_ptr.vmem [resolvable:$true] %s1111_s29 }
  0x6d   : > { %1257 = vmatpush3.bf16.msra.mxu0 %v1411_v1  ;;  %v1415_v5 = vld [vmem:[#allocation5 + $0x10] sm:$0xff]   ;;  %v1416_v6 = vld [vmem:[#allocation5 + $0x58] sm:$0xff]   ;;  %v1418_v8 = vld [vmem:[#allocation5 + $0x60] sm:$0xff]   ;;  %s2115_s28 = scalar_lea.hbm %s2168_s5, %s1255_s13  ;;  %s1650_s14 = scalar_lea.vmem %s2117_s29, 4864 }
  0x6e   : > { %1258 = vmatprep.subr.bf16.mxu0 %v1412_v2  ;;  %v1417_v7 = vld [vmem:[#allocation5 + $0x18] sm:$0xff]   ;;  %v1419_v9 = vld [vmem:[#allocation5 + $0x20] sm:$0xff]   ;;  %v1420_v10 = vld [vmem:[#allocation5 + $0x68] sm:$0xff]   ;;  %p1651_p11 = scmp.ne.s32.totalorder %s2117_s29, %s1650_s14  ;;  %p2182_p0 = scmp.ne.s32.totalorder %s2177_s30, 0 }
  0x6f   : > { %v277_v11 = vld [vmem:[%s1943_s9 + $0x8] sm:$0xff]  ;;  %v279_v12 = vld [vmem:[%s1943_s9 + $0x18] sm:$0xff]  ;;  %v1422_v15 = vld [vmem:[#allocation5 + $0x70] sm:$0xff]   ;;  %s1732_s15 = smov [#allocation8]  }
  0x70   : > { %v315_v13 = vpack.c.bf16 %v279_v12, %v277_v11  ;;  %v1421_v14 = vld [vmem:[#allocation5 + $0x28] sm:$0xff]   ;;  %v1423_v16 = vld [vmem:[#allocation5 + $0x30] sm:$0xff]   ;;  %v1424_v17 = vld [vmem:[#allocation5 + $0x78] sm:$0xff]   ;;  %p1652_p1 = pnand %p1651_p11, %p2182_p0  ;;  %s1654_s23 = sshll.u32 %s1732_s15, 4  ;;  %s1655_s23 = int_to_ptr.vmem [resolvable:$false] %s1654_s23 }
  0x71   : > { %1259 = vmatpush3.bf16.msra.mxu0 %v1413_v3  ;;  %v1425_v18 = vld [vmem:[#allocation5 + $0x38] sm:$0xff]   ;;  %v276_v19 = vld [vmem:[%s1943_s9] sm:$0xff]  ;;  %v278_v20 = vld [vmem:[%s1943_s9 + $0x10] sm:$0xff]  ;;  %s1656_s6 = scalar_lea.vmem %s1655_s23, 9728  ;;  %p1657_p5 = scmp.lt.s32.totalorder %s2117_s29, %s1655_s23 }
  0x72   : > { %1260 = vmatprep.subr.bf16.mxu0 %v1414_v4  ;;  %501 = vmatprep.mubr.bf16.mxu0 %v315_v13  ;;  %v281_v21 = vld [vmem:[%s1943_s9 + $0x28] sm:$0xff]  ;;  %v283_v22 = vld [vmem:[%s1943_s9 + $0x38] sm:$0xff]  ;;  %v314_v25 = vpack.c.bf16 %v278_v20, %v276_v19  ;;  %v280_v28 = vld [vmem:[%s1943_s9 + $0x20] sm:$0xff]  ;;  %p1653_p3 = pneg %p1652_p1  ;;  %p1658_p9 = scmp.lt.s32.totalorder %s1656_s6, %s1650_s14 }
  0x73   : > { %v1426_v23 = vld [vmem:[#allocation7 + $0x4] ss:$8 sps:$4 sm:$0xff]   ;;  %v1428_v24 = vld [vmem:[#allocation7] ss:$8 sps:$4 sm:$0xff]   ;;  %v1429_v26 = vld [vmem:[#allocation7 + $0x14] ss:$8 sps:$4 sm:$0xff]   ;;  %v317_v27 = vpack.c.bf16 %v283_v22, %v281_v21 }
  0x74   : > { %775 = vmatprep.subr.bf16.mxu1 %v1426_v23  ;;  %v282_v29 = vld [vmem:[%s1943_s9 + $0x30] sm:$0xff]  ;;  %v285_v30 = vld [vmem:[%s1943_s9 + $0x48] sm:$0xff]  ;;  %v287_v31 = vld [vmem:[%s1943_s9 + $0x58] sm:$0xff]  ;;  %p1659_p12 = por %p1658_p9, %p1657_p5 }
  0x75   : > { %1261 = vmatpush3.bf16.msra.mxu0 %v1415_v5  ;;  %776 = vmatpush1.bf16.msra.mxu1 %v1428_v24  ;;  %v316_v32 = vpack.c.bf16 %v282_v29, %v280_v28  ;;  %v319_v33 = vpack.c.bf16 %v287_v31, %v285_v30  ;;  %v284_v34 = vld [vmem:[%s1943_s9 + $0x40] sm:$0xff]  ;;  %v286_v35 = vld [vmem:[%s1943_s9 + $0x50] sm:$0xff]  ;;  %v289_v36 = vld [vmem:[%s1943_s9 + $0x68] sm:$0xff] }
  0x76   : > { %1262 = vmatprep.subr.bf16.mxu0 %v1416_v6  ;;  %777 = vmatprep.subr.bf16.mxu1 %v1429_v26  ;;  %v291_v37 = vld [vmem:[%s1943_s9 + $0x78] sm:$0xff]  ;;  %v318_v38 = vpack.c.bf16 %v286_v35, %v284_v34  ;;  %v288_v40 = vld [vmem:[%s1943_s9 + $0x60] sm:$0xff]  ;;  %v290_v41 = vld [vmem:[%s1943_s9 + $0x70] sm:$0xff]  ;;  %v1731_v26 = vmov 0   ;;  %p1660_p2 = pnand %p1659_p12, %p1653_p3 }
  0x77   : > { %v321_v39 = vpack.c.bf16 %v291_v37, %v289_v36  ;;  %v293_v42 = vld [vmem:[%s1943_s9 + $0x88] sm:$0xff]  ;;  %v295_v43 = vld [vmem:[%s1943_s9 + $0x98] sm:$0xff]  ;;  %v320_v44 = vpack.c.bf16 %v290_v41, %v288_v40  ;;  %v292_v46 = vld [vmem:[%s1943_s9 + $0x80] sm:$0xff]  ;;  %807 = vmatprep.mubr.bf16.mxu1 %v1731_v26 }
  0x78   : > { %v323_v45 = vpack.c.bf16 %v295_v43, %v293_v42  ;;  %v294_v47 = vld [vmem:[%s1943_s9 + $0x90] sm:$0xff]  ;;  %v297_v48 = vld [vmem:[%s1943_s9 + $0xa8] sm:$0xff]  ;;  %v299_v49 = vld [vmem:[%s1943_s9 + $0xb8] sm:$0xff] }
  0x79   : > { %1263 = vmatpush3.bf16.msra.mxu0 %v1417_v7  ;;  %v322_v50 = vpack.c.bf16 %v294_v47, %v292_v46  ;;  %v325_v51 = vpack.c.bf16 %v299_v49, %v297_v48  ;;  %v296_v52 = vld [vmem:[%s1943_s9 + $0xa0] sm:$0xff]  ;;  %v298_v53 = vld [vmem:[%s1943_s9 + $0xb0] sm:$0xff]  ;;  %v301_v54 = vld [vmem:[%s1943_s9 + $0xc8] sm:$0xff] }
  0x7a   : > { %1264 = vmatprep.subr.bf16.mxu0 %v1418_v8  ;;  %v303_v55 = vld [vmem:[%s1943_s9 + $0xd8] sm:$0xff]  ;;  %v324_v56 = vpack.c.bf16 %v298_v53, %v296_v52  ;;  %v300_v58 = vld [vmem:[%s1943_s9 + $0xc0] sm:$0xff]  ;;  %v302_v59 = vld [vmem:[%s1943_s9 + $0xd0] sm:$0xff] }
  0x7b   : > { %v327_v57 = vpack.c.bf16 %v303_v55, %v301_v54  ;;  %v305_v60 = vld [vmem:[%s1943_s9 + $0xe8] sm:$0xff]  ;;  %v307_v61 = vld [vmem:[%s1943_s9 + $0xf8] sm:$0xff]  ;;  %v326_v62 = vpack.c.bf16 %v302_v59, %v300_v58  ;;  %v304_v0 = vld [vmem:[%s1943_s9 + $0xe0] sm:$0xff] }
  0x7c   : > { %v329_v63 = vpack.c.bf16 %v307_v61, %v305_v60  ;;  %v306_v1 = vld [vmem:[%s1943_s9 + $0xf0] sm:$0xff]  ;;  %v309_v2 = vld [vmem:[%s1943_s9 + $0x108] sm:$0xff]  ;;  %v311_v3 = vld [vmem:[%s1943_s9 + $0x118] sm:$0xff] }
  0x7d   : > { %1265 = vmatpush3.bf16.msra.mxu0 %v1419_v9  ;;  %v328_v4 = vpack.c.bf16 %v306_v1, %v304_v0  ;;  %v331_v5 = vpack.c.bf16 %v311_v3, %v309_v2  ;;  %v308_v6 = vld [vmem:[%s1943_s9 + $0x100] sm:$0xff]  ;;  %v310_v7 = vld [vmem:[%s1943_s9 + $0x110] sm:$0xff]  ;;  %v313_v8 = vld [vmem:[%s1943_s9 + $0x128] sm:$0xff] }
  0x7e   : > { %1266 = vmatprep.subr.bf16.mxu0 %v1420_v10  ;;  %v330_v9 = vpack.c.bf16 %v310_v7, %v308_v6  ;;  %v333_v10 = vpack.c.bf16 %v313_v8, %v313_v8  ;;  %v312_v11 = vld [vmem:[%s1943_s9 + $0x120] sm:$0xff] }
  0x7f   : > { %v332_v12 = vpack.c.bf16 %v312_v11, %v312_v11  ;;  %v1431_v13 = vld [vmem:[#allocation7 + $0x10] ss:$8 sps:$4 sm:$0xff]   ;;  %v1440_v19 = vld [vmem:[#allocation7 + $0x40] ss:$8 sps:$4 sm:$0xff]   ;;  %v1441_v20 = vld [vmem:[#allocation7 + $0x54] ss:$8 sps:$4 sm:$0xff]  }
  0x80   : > { %778 = vmatpush1.bf16.msra.mxu1 %v1431_v13  ;;  %v1443_v21 = vld [vmem:[#allocation7 + $0x50] ss:$8 sps:$4 sm:$0xff]   ;;  %v1444_v22 = vld [vmem:[#allocation7 + $0x64] ss:$8 sps:$4 sm:$0xff]   ;;  %v1446_v23 = vld [vmem:[#allocation7 + $0x60] ss:$8 sps:$4 sm:$0xff]  }
  0x81   : > { %1267 = vmatpush3.bf16.msra.mxu0 %v1421_v14  ;;  %v1432_v14 = vld [vmem:[#allocation7 + $0x24] ss:$8 sps:$4 sm:$0xff]   ;;  %v1447_v24 = vld [vmem:[#allocation7 + $0x74] ss:$8 sps:$4 sm:$0xff]   ;;  %v1995_v28 = vld [vmem:[%s2165_s2] ss:$0 sm:$0xff] }
  0x82   : > { %1268 = vmatprep.subr.bf16.mxu0 %v1422_v15  ;;  %v1434_v15 = vld [vmem:[#allocation7 + $0x20] ss:$8 sps:$4 sm:$0xff]   ;;  %779 = vmatprep.subr.bf16.mxu1 %v1432_v14 }
  0x84   : > { %780 = vmatpush1.bf16.msra.mxu1 %v1434_v15 }
  0x85   : > { %1269 = vmatpush3.bf16.msra.mxu0 %v1423_v16  ;;  %v1435_v16 = vld [vmem:[#allocation7 + $0x34] ss:$8 sps:$4 sm:$0xff]  }
  0x86   : > { %1270 = vmatprep.subr.bf16.mxu0 %v1424_v17  ;;  %v1437_v17 = vld [vmem:[#allocation7 + $0x30] ss:$8 sps:$4 sm:$0xff]   ;;  %781 = vmatprep.subr.bf16.mxu1 %v1435_v16 }
  0x88   : > { %782 = vmatpush1.bf16.msra.mxu1 %v1437_v17 }
  0x89   : > { %1271 = vmatpush3.bf16.msra.mxu0 %v1425_v18  ;;  %v1438_v18 = vld [vmem:[#allocation7 + $0x44] ss:$8 sps:$4 sm:$0xff]  }
  0x8a   : > { %783 = vmatprep.subr.bf16.mxu1 %v1438_v18 }
  0x8c   : > { %502 = vmatmul.mubr.bf16.vlgmr.msra.gmra.mrb[0].mxu0 %v314_v25  ;;  %784 = vmatpush1.bf16.msra.mxu1 %v1440_v19  ;;  %v1449_v25 = vld [vmem:[#allocation7 + $0x70] ss:$8 sps:$4 sm:$0xff]  }
  0x8d   : > { %509 = vmatprep.mubr.bf16.mxu0 %v317_v27  ;;  %785 = vmatprep.subr.bf16.mxu1 %v1441_v20 }
  0x90   : > { %786 = vmatpush1.bf16.msra.mxu1 %v1443_v21 }
  0x91   : > { %787 = vmatprep.subr.bf16.mxu1 %v1444_v22 }
  0x94   : > { %510 = vmatmul.mubr.bf16.gmra.mrb[4].mxu0 %v316_v32  ;;  %788 = vmatpush1.bf16.msra.mxu1 %v1446_v23 }
  0x95   : > { %517 = vmatprep.mubr.bf16.mxu0 %v319_v33  ;;  %789 = vmatprep.subr.bf16.mxu1 %v1447_v24 }
  0x98   : > { %790 = vmatpush1.bf16.msra.mxu1 %v1449_v25 }
  0x9c   : > { %518 = vmatmul.mubr.bf16.gmra.mrb[8].mxu0 %v318_v38 }
  0x9d   : > { %525 = vmatprep.mubr.bf16.mxu0 %v321_v39 }
  0xa4   : > { %526 = vmatmul.mubr.bf16.gmra.mrb[12].mxu0 %v320_v44 }
  0xa5   : > { %533 = vmatprep.mubr.bf16.mxu0 %v323_v45 }
  0xac   : > { %534 = vmatmul.mubr.bf16.gmra.mrb[16].mxu0 %v322_v50 }
  0xad   : > { %541 = vmatprep.mubr.bf16.mxu0 %v325_v51 }
  0xb4   : > { %542 = vmatmul.mubr.bf16.gmra.mrb[20].mxu0 %v324_v56 }
  0xb5   : > { %549 = vmatprep.mubr.bf16.mxu0 %v327_v57 }
  0xbc   : > { %550 = vmatmul.mubr.bf16.gmra.mrb[24].mxu0 %v326_v62 }
  0xbd   : > { %557 = vmatprep.mubr.bf16.mxu0 %v329_v63 }
  0xc4   : > { %558 = vmatmul.mubr.bf16.gmra.mrb[28].mxu0 %v328_v4 }
  0xc5   : > { %565 = vmatprep.mubr.bf16.mxu0 %v331_v5 }
  0xcc   : > { %566 = vmatmul.mubr.bf16.gmra.mrb[32].mxu0 %v330_v9 }
  0xcd   : > { %573 = vmatprep.mubr.bf16.mxu0 %v333_v10 }
  0xd4   : > { %574 = vmatmul.mubr.bf16.gmra.mrb[36].mxu0 %v332_v12 }
 0x15f   : > { %v1272_v27 = vpop.f32.mrb[0].mxu0 }
 0x160   : > { %v1273_v29 = vpop.f32.mrb[1].mxu0 }
 0x161   : > { %v1274_v30 = vadd.f32 %v1273_v29, %v1272_v27  ;;  %v1275_v31 = vpop.f32.mrb[2].mxu0 }
 0x162   : > { %v1276_v32 = vpop.f32.mrb[3].mxu0 }
 0x163   : > { %v504_v33 = vadd.f32 %v1274_v30, %v1995_v28  ;;  %v1277_v34 = vadd.f32 %v1276_v32, %v1275_v31 }
 0x165   : > { %v581_v35 = vmul.f32 0.5, %v504_v33  ;;  %v507_v36 = vadd.f32 %v1277_v34, %v1995_v28 }
 0x167   : > { %1450 = vtanh.f32 %v581_v35  ;;  %v582_v37 = vmul.f32 0.5, %v507_v36  ;;  %v1278_v38 = vpop.f32.mrb[4].mxu0 }
 0x168   : > { %v1279_v39 = vpop.f32.mrb[5].mxu0 }
 0x169   : > { %1452 = vtanh.f32 %v582_v37  ;;  %v1280_v40 = vadd.f32 %v1279_v39, %v1278_v38  ;;  %v1281_v41 = vpop.f32.mrb[6].mxu0 }
 0x16a   : > { %v1282_v42 = vpop.f32.mrb[7].mxu0 }
 0x16b   : > { %v512_v43 = vadd.f32 %v1280_v40, %v1995_v28  ;;  %v1283_v44 = vadd.f32 %v1282_v42, %v1281_v41 }
 0x16d   : > { %v583_v45 = vmul.f32 0.5, %v512_v43  ;;  %v515_v46 = vadd.f32 %v1283_v44, %v1995_v28 }
 0x16f   : > { %1454 = vtanh.f32 %v583_v45  ;;  %v584_v47 = vmul.f32 0.5, %v515_v46  ;;  %v1284_v48 = vpop.f32.mrb[8].mxu0 }
 0x170   : > { %v1285_v49 = vpop.f32.mrb[9].mxu0 }
 0x171   : > { %v1451_v50 = vpop.eup %1450  ;;  %1456 = vtanh.f32 %v584_v47  ;;  %v1286_v51 = vadd.f32 %v1285_v49, %v1284_v48  ;;  %v1287_v52 = vpop.f32.mrb[10].mxu0 }
 0x172   : > { %v619_v53 = vmul.f32 0.5, %v1451_v50  ;;  %v1288_v54 = vpop.f32.mrb[11].mxu0 }
 0x173   : > { %v1453_v55 = vpop.eup %1452  ;;  %v520_v56 = vadd.f32 %v1286_v51, %v1995_v28  ;;  %v1289_v57 = vadd.f32 %v1288_v54, %v1287_v52 }
 0x174   : > { %v620_v58 = vmul.f32 0.5, %v1453_v55  ;;  %v638_v61 = vadd.f32 0.5, %v619_v53 }
 0x175   : > { %v585_v59 = vmul.f32 0.5, %v520_v56  ;;  %v523_v60 = vadd.f32 %v1289_v57, %v1995_v28 }
 0x176   : > { %v639_v62 = vadd.f32 0.5, %v620_v58 }
 0x177   : > { %1458 = vtanh.f32 %v585_v59  ;;  %v586_v63 = vmul.f32 0.5, %v523_v60  ;;  %v1290_v0 = vpop.f32.mrb[12].mxu0 }
 0x178   : > { %v1291_v1 = vpop.f32.mrb[13].mxu0  ;;  %v657_v2 = vpack.c.bf16 %v639_v62, %v638_v61 }
 0x179   : > { %v1455_v3 = vpop.eup %1454  ;;  %1460 = vtanh.f32 %v586_v63  ;;  %v1292_v4 = vadd.f32 %v1291_v1, %v1290_v0  ;;  %v1293_v5 = vpop.f32.mrb[14].mxu0 }
 0x17a   : > { %v621_v6 = vmul.f32 0.5, %v1455_v3  ;;  %v1294_v7 = vpop.f32.mrb[15].mxu0  ;;  %808 = vmatmul.mubr.bf16.vlgmr.msra.gmra.mrb[0].mxu1 %v657_v2 }
 0x17b   : > { %v1457_v8 = vpop.eup %1456  ;;  %v528_v9 = vadd.f32 %v1292_v4, %v1995_v28  ;;  %v1295_v10 = vadd.f32 %v1294_v7, %v1293_v5  ;;  %817 = vmatprep.mubr.bf16.mxu1 %v1731_v26 }
 0x17c   : > { %v622_v11 = vmul.f32 0.5, %v1457_v8  ;;  %v640_v14 = vadd.f32 0.5, %v621_v6 }
 0x17d   : > { %v587_v12 = vmul.f32 0.5, %v528_v9  ;;  %v531_v13 = vadd.f32 %v1295_v10, %v1995_v28 }
 0x17e   : > { %v641_v15 = vadd.f32 0.5, %v622_v11 }
 0x17f   : > { %1462 = vtanh.f32 %v587_v12  ;;  %v588_v16 = vmul.f32 0.5, %v531_v13  ;;  %v1296_v17 = vpop.f32.mrb[16].mxu0 }
 0x180   : > { %v1297_v18 = vpop.f32.mrb[17].mxu0  ;;  %v658_v19 = vpack.c.bf16 %v641_v15, %v640_v14 }
 0x181   : > { %v1459_v20 = vpop.eup %1458  ;;  %1464 = vtanh.f32 %v588_v16  ;;  %v1298_v21 = vadd.f32 %v1297_v18, %v1296_v17  ;;  %v1299_v22 = vpop.f32.mrb[18].mxu0 }
 0x182   : > { %v623_v23 = vmul.f32 0.5, %v1459_v20  ;;  %v1300_v24 = vpop.f32.mrb[19].mxu0  ;;  %818 = vmatmul.mubr.bf16.gmra.mrb[4].mxu1 %v658_v19 }
 0x183   : > { %v1461_v25 = vpop.eup %1460  ;;  %v536_v27 = vadd.f32 %v1298_v21, %v1995_v28  ;;  %v1301_v29 = vadd.f32 %v1300_v24, %v1299_v22  ;;  %827 = vmatprep.mubr.bf16.mxu1 %v1731_v26 }
 0x184   : > { %v624_v30 = vmul.f32 0.5, %v1461_v25  ;;  %v642_v33 = vadd.f32 0.5, %v623_v23 }
 0x185   : > { %v589_v31 = vmul.f32 0.5, %v536_v27  ;;  %v539_v32 = vadd.f32 %v1301_v29, %v1995_v28 }
 0x186   : > { %v643_v34 = vadd.f32 0.5, %v624_v30 }
 0x187   : > { %1466 = vtanh.f32 %v589_v31  ;;  %v590_v35 = vmul.f32 0.5, %v539_v32  ;;  %v1302_v36 = vpop.f32.mrb[20].mxu0 }
 0x188   : > { %v1303_v37 = vpop.f32.mrb[21].mxu0  ;;  %v659_v38 = vpack.c.bf16 %v643_v34, %v642_v33 }
 0x189   : > { %v1463_v39 = vpop.eup %1462  ;;  %1468 = vtanh.f32 %v590_v35  ;;  %v1304_v40 = vadd.f32 %v1303_v37, %v1302_v36  ;;  %v1305_v41 = vpop.f32.mrb[22].mxu0 }
 0x18a   : > { %v625_v42 = vmul.f32 0.5, %v1463_v39  ;;  %v1306_v43 = vpop.f32.mrb[23].mxu0  ;;  %828 = vmatmul.mubr.bf16.gmra.mrb[8].mxu1 %v659_v38 }
 0x18b   : > { %v1465_v44 = vpop.eup %1464  ;;  %v544_v45 = vadd.f32 %v1304_v40, %v1995_v28  ;;  %v1307_v46 = vadd.f32 %v1306_v43, %v1305_v41  ;;  %837 = vmatprep.mubr.bf16.mxu1 %v1731_v26 }
 0x18c   : > { %v626_v47 = vmul.f32 0.5, %v1465_v44  ;;  %v644_v50 = vadd.f32 0.5, %v625_v42 }
 0x18d   : > { %v591_v48 = vmul.f32 0.5, %v544_v45  ;;  %v547_v49 = vadd.f32 %v1307_v46, %v1995_v28 }
 0x18e   : > { %v645_v51 = vadd.f32 0.5, %v626_v47 }
 0x18f   : > { %1470 = vtanh.f32 %v591_v48  ;;  %v592_v52 = vmul.f32 0.5, %v547_v49  ;;  %v1308_v53 = vpop.f32.mrb[24].mxu0 }
 0x190   : > { %v1309_v54 = vpop.f32.mrb[25].mxu0  ;;  %v660_v55 = vpack.c.bf16 %v645_v51, %v644_v50 }
 0x191   : > { %v1467_v56 = vpop.eup %1466  ;;  %1472 = vtanh.f32 %v592_v52  ;;  %v1310_v57 = vadd.f32 %v1309_v54, %v1308_v53  ;;  %v1311_v58 = vpop.f32.mrb[26].mxu0 }
 0x192   : > { %v627_v59 = vmul.f32 0.5, %v1467_v56  ;;  %v1312_v60 = vpop.f32.mrb[27].mxu0  ;;  %838 = vmatmul.mubr.bf16.gmra.mrb[12].mxu1 %v660_v55 }
 0x193   : > { %v1469_v61 = vpop.eup %1468  ;;  %v552_v62 = vadd.f32 %v1310_v57, %v1995_v28  ;;  %v1313_v63 = vadd.f32 %v1312_v60, %v1311_v58  ;;  %847 = vmatprep.mubr.bf16.mxu1 %v1731_v26 }
 0x194   : > { %v628_v0 = vmul.f32 0.5, %v1469_v61  ;;  %v646_v3 = vadd.f32 0.5, %v627_v59 }
 0x195   : > { %v593_v1 = vmul.f32 0.5, %v552_v62  ;;  %v555_v2 = vadd.f32 %v1313_v63, %v1995_v28 }
 0x196   : > { %v647_v4 = vadd.f32 0.5, %v628_v0 }
 0x197   : > { %1474 = vtanh.f32 %v593_v1  ;;  %v594_v5 = vmul.f32 0.5, %v555_v2  ;;  %v1314_v6 = vpop.f32.mrb[28].mxu0 }
 0x198   : > { %v1315_v7 = vpop.f32.mrb[29].mxu0  ;;  %v661_v8 = vpack.c.bf16 %v647_v4, %v646_v3  ;;  %v685_v3 = vlaneseq }
 0x199   : > { %v1471_v9 = vpop.eup %1470  ;;  %1476 = vtanh.f32 %v594_v5  ;;  %v1316_v10 = vadd.f32 %v1315_v7, %v1314_v6  ;;  %v1317_v11 = vpop.f32.mrb[30].mxu0  ;;  %v683_v6 = vld [vmem:[%s2167_s4] sm:$0x3] }
 0x19a   : > { %v629_v12 = vmul.f32 0.5, %v1471_v9  ;;  %v1318_v13 = vpop.f32.mrb[31].mxu0  ;;  %848 = vmatmul.mubr.bf16.gmra.mrb[16].mxu1 %v661_v8  ;;  %v686_v4 = vshrl.u32 %v685_v3, 7 }
 0x19b   : > { %v1473_v14 = vpop.eup %1472  ;;  %v560_v15 = vadd.f32 %v1316_v10, %v1995_v28  ;;  %v1319_v16 = vadd.f32 %v1318_v13, %v1317_v11  ;;  %857 = vmatprep.mubr.bf16.mxu1 %v1731_v26 }
 0x19c   : > { %v630_v17 = vmul.f32 0.5, %v1473_v14  ;;  %v648_v20 = vadd.f32 0.5, %v629_v12  ;;  %v687_v5 = vsub.s32 0, %v686_v4  ;;  %v691_v7 = vsub.s32 1, %v686_v4 }
 0x19d   : > { %v595_v18 = vmul.f32 0.5, %v560_v15  ;;  %v563_v19 = vadd.f32 %v1319_v16, %v1995_v28 }
 0x19e   : > { %v649_v21 = vadd.f32 0.5, %v630_v17  ;;  %v2028_v8 = vrot.slane %v683_v6, %v687_v5  ;;  %v2030_v9 = vrot.slane %v683_v6, %v691_v7 }
 0x19f   : > { %1478 = vtanh.f32 %v595_v18  ;;  %v596_v22 = vmul.f32 0.5, %v563_v19  ;;  %v1320_v23 = vpop.f32.mrb[32].mxu0 }
 0x1a0   : > { %v1321_v24 = vpop.f32.mrb[33].mxu0  ;;  %v662_v25 = vpack.c.bf16 %v649_v21, %v648_v20 }
 0x1a1   : > { %v1475_v27 = vpop.eup %1474  ;;  %1480 = vtanh.f32 %v596_v22  ;;  %v1322_v29 = vadd.f32 %v1321_v24, %v1320_v23  ;;  %v1323_v30 = vpop.f32.mrb[34].mxu0 }
 0x1a2   : > { %v631_v31 = vmul.f32 0.5, %v1475_v27  ;;  %v1324_v32 = vpop.f32.mrb[35].mxu0  ;;  %858 = vmatmul.mubr.bf16.gmra.mrb[20].mxu1 %v662_v25 }
 0x1a3   : > { %v1477_v33 = vpop.eup %1476  ;;  %v568_v34 = vadd.f32 %v1322_v29, %v1995_v28  ;;  %v1325_v35 = vadd.f32 %v1324_v32, %v1323_v30  ;;  %867 = vmatprep.mubr.bf16.mxu1 %v1731_v26 }
 0x1a4   : > { %v632_v36 = vmul.f32 0.5, %v1477_v33  ;;  %v650_v39 = vadd.f32 0.5, %v631_v31 }
 0x1a5   : > { %v597_v37 = vmul.f32 0.5, %v568_v34  ;;  %v571_v38 = vadd.f32 %v1325_v35, %v1995_v28 }
 0x1a6   : > { %v651_v40 = vadd.f32 0.5, %v632_v36 }
 0x1a7   : > { %1482 = vtanh.f32 %v597_v37  ;;  %v598_v41 = vmul.f32 0.5, %v571_v38  ;;  %v1326_v42 = vpop.f32.mrb[36].mxu0 }
 0x1a8   : > { %v1327_v43 = vpop.f32.mrb[37].mxu0  ;;  %v663_v44 = vpack.c.bf16 %v651_v40, %v650_v39 }
 0x1a9   : > { %v1479_v45 = vpop.eup %1478  ;;  %1484 = vtanh.f32 %v598_v41  ;;  %v1328_v46 = vadd.f32 %v1327_v43, %v1326_v42  ;;  %v1329_v47 = vpop.f32.mrb[38].mxu0 }
 0x1aa   : > { %v633_v48 = vmul.f32 0.5, %v1479_v45  ;;  %v1330_v49 = vpop.f32.mrb[39].mxu0  ;;  %868 = vmatmul.mubr.bf16.gmra.mrb[24].mxu1 %v663_v44 }
 0x1ab   : > { %v1481_v50 = vpop.eup %1480  ;;  %v576_v51 = vadd.f32 %v1328_v46, %v1995_v28  ;;  %877 = vmatprep.mubr.bf16.mxu1 %v1731_v26 }
 0x1ac   : > { %v634_v52 = vmul.f32 0.5, %v1481_v50  ;;  %v652_v54 = vadd.f32 0.5, %v633_v48 }
 0x1ad   : > { %v599_v53 = vmul.f32 0.5, %v576_v51 }
 0x1ae   : > { %v653_v55 = vadd.f32 0.5, %v634_v52 }
 0x1af   : > { %1486 = vtanh.f32 %v599_v53 }
 0x1b0   : > { %v664_v56 = vpack.c.bf16 %v653_v55, %v652_v54 }
 0x1b1   : > { %v1483_v57 = vpop.eup %1482 }
 0x1b2   : > { %v635_v58 = vmul.f32 0.5, %v1483_v57  ;;  %878 = vmatmul.mubr.bf16.gmra.mrb[28].mxu1 %v664_v56 }
 0x1b3   : > { %v1485_v59 = vpop.eup %1484  ;;  %887 = vmatprep.mubr.bf16.mxu1 %v1731_v26 }
 0x1b4   : > { %v636_v60 = vmul.f32 0.5, %v1485_v59  ;;  %v654_v61 = vadd.f32 0.5, %v635_v58 }
 0x1b6   : > { %v655_v62 = vadd.f32 0.5, %v636_v60 }
 0x1b8   : > { %v665_v63 = vpack.c.bf16 %v655_v62, %v654_v61 }
 0x1b9   : > { %v1487_v0 = vpop.eup %1486 }
 0x1ba   : > { %888 = vmatmul.mubr.bf16.gmra.mrb[32].mxu1 %v665_v63  ;;  %v637_v28 = vmul.f32 0.5, %v1487_v0 }
 0x1bb   : > { %897 = vmatprep.mubr.bf16.mxu1 %v1731_v26 }
 0x1bc   : > { %v656_v1 = vadd.f32 0.5, %v637_v28 }
 0x1be   : > { %v666_v2 = vpack.c.bf16 %v656_v1, %v656_v1 }
 0x1c2   : > { %898 = vmatmul.mubr.bf16.gmra.mrb[36].mxu1 %v666_v2 }
 0x24d   : > { %v809_v10 = vpop.f32.mrb[0].mxu1 }
 0x24e   : > { %v810_v11 = vadd.f32 %v809_v10, %v2028_v8  ;;  %v811_v12 = vpop.f32.mrb[1].mxu1 }
 0x24f   : > { %v812_v26 = vadd.f32 %v811_v12, %v2030_v9  ;;  %v813_v13 = vpop.f32.mrb[2].mxu1 }
 0x250   : > { %v906_v14 = vmul.f32 0.5, %v810_v11  ;;  %v814_v15 = vadd.f32 %v813_v13, %v2028_v8  ;;  %v815_v16 = vpop.f32.mrb[3].mxu1 }
 0x251   : > { %v907_v17 = vmul.f32 0.5, %v812_v26  ;;  %v816_v18 = vadd.f32 %v815_v16, %v2030_v9 }
 0x252   : > { %1488 = vtanh.f32 %v906_v14  ;;  %v908_v19 = vmul.f32 0.5, %v814_v15 }
 0x253   : > { %1490 = vtanh.f32 %v907_v17  ;;  %v909_v20 = vmul.f32 0.5, %v816_v18 }
 0x254   : > { %1492 = vtanh.f32 %v908_v19 }
 0x255   : > { %1494 = vtanh.f32 %v909_v20  ;;  %v819_v21 = vpop.f32.mrb[4].mxu1 }
 0x256   : > { %v820_v22 = vadd.f32 %v819_v21, %v2028_v8  ;;  %v821_v23 = vpop.f32.mrb[5].mxu1 }
 0x257   : > { %v822_v24 = vadd.f32 %v821_v23, %v2030_v9  ;;  %v823_v25 = vpop.f32.mrb[6].mxu1 }
 0x258   : > { %v910_v27 = vmul.f32 0.5, %v820_v22  ;;  %v824_v29 = vadd.f32 %v823_v25, %v2028_v8  ;;  %v825_v30 = vpop.f32.mrb[7].mxu1 }
 0x259   : > { %v911_v31 = vmul.f32 0.5, %v822_v24  ;;  %v826_v32 = vadd.f32 %v825_v30, %v2030_v9 }
 0x25a   : > { %1496 = vtanh.f32 %v910_v27  ;;  %v912_v33 = vmul.f32 0.5, %v824_v29 }
 0x25b   : > { %1498 = vtanh.f32 %v911_v31  ;;  %v913_v34 = vmul.f32 0.5, %v826_v32 }
 0x25c   : > { %v1489_v35 = vpop.eup %1488  ;;  %1500 = vtanh.f32 %v912_v33 }
 0x25d   : > { %v1491_v36 = vpop.eup %1490  ;;  %v982_v37 = vmul.f32 0.5, %v1489_v35  ;;  %1502 = vtanh.f32 %v913_v34  ;;  %v829_v38 = vpop.f32.mrb[8].mxu1 }
 0x25e   : > { %v1493_v39 = vpop.eup %1492  ;;  %v983_v40 = vmul.f32 0.5, %v1491_v36  ;;  %v830_v41 = vadd.f32 %v829_v38, %v2028_v8  ;;  %v831_v42 = vpop.f32.mrb[9].mxu1 }
 0x25f   : > { %v1495_v43 = vpop.eup %1494  ;;  %v1020_v44 = vadd.f32 0.5, %v982_v37  ;;  %v984_v45 = vmul.f32 0.5, %v1493_v39  ;;  %v832_v46 = vadd.f32 %v831_v42, %v2030_v9  ;;  %v833_v47 = vpop.f32.mrb[10].mxu1 }
 0x260   : > { %v1021_v48 = vadd.f32 0.5, %v983_v40  ;;  %v985_v49 = vmul.f32 0.5, %v1495_v43  ;;  %v914_v50 = vmul.f32 0.5, %v830_v41  ;;  %v834_v51 = vadd.f32 %v833_v47, %v2028_v8  ;;  %v835_v52 = vpop.f32.mrb[11].mxu1 }
 0x261   : > { %1058 = vst [vmem:[%s2045_s12] sm:$0xff] %v1020_v44  ;;  %v1022_v53 = vadd.f32 0.5, %v984_v45  ;;  %v915_v54 = vmul.f32 0.5, %v832_v46  ;;  %v836_v55 = vadd.f32 %v835_v52, %v2030_v9 }
 0x262   : > { %1059 = vst [vmem:[%s2045_s12 + $0x8] sm:$0xff] %v1021_v48  ;;  %v1023_v56 = vadd.f32 0.5, %v985_v49  ;;  %1504 = vtanh.f32 %v914_v50  ;;  %v916_v57 = vmul.f32 0.5, %v834_v51 }
 0x263   : > { %1060 = vst [vmem:[%s2045_s12 + $0x10] sm:$0xff] %v1022_v53  ;;  %1506 = vtanh.f32 %v915_v54  ;;  %v917_v58 = vmul.f32 0.5, %v836_v55 }
 0x264   : > { %v1497_v59 = vpop.eup %1496  ;;  %1061 = vst [vmem:[%s2045_s12 + $0x18] sm:$0xff] %v1023_v56  ;;  %1508 = vtanh.f32 %v916_v57 }
 0x265   : > { %v1499_v60 = vpop.eup %1498  ;;  %v986_v61 = vmul.f32 0.5, %v1497_v59  ;;  %1510 = vtanh.f32 %v917_v58  ;;  %v839_v62 = vpop.f32.mrb[12].mxu1 }
 0x266   : > { %v1501_v63 = vpop.eup %1500  ;;  %v987_v0 = vmul.f32 0.5, %v1499_v60  ;;  %v840_v28 = vadd.f32 %v839_v62, %v2028_v8  ;;  %v841_v1 = vpop.f32.mrb[13].mxu1 }
 0x267   : > { %v1503_v2 = vpop.eup %1502  ;;  %v1024_v3 = vadd.f32 0.5, %v986_v61  ;;  %v988_v4 = vmul.f32 0.5, %v1501_v63  ;;  %v842_v5 = vadd.f32 %v841_v1, %v2030_v9  ;;  %v843_v6 = vpop.f32.mrb[14].mxu1 }
 0x268   : > { %v1025_v7 = vadd.f32 0.5, %v987_v0  ;;  %v989_v10 = vmul.f32 0.5, %v1503_v2  ;;  %v918_v11 = vmul.f32 0.5, %v840_v28  ;;  %v844_v12 = vadd.f32 %v843_v6, %v2028_v8  ;;  %v845_v26 = vpop.f32.mrb[15].mxu1 }
 0x269   : > { %1062 = vst [vmem:[%s2045_s12 + $0x20] sm:$0xff] %v1024_v3  ;;  %v1026_v13 = vadd.f32 0.5, %v988_v4  ;;  %v919_v14 = vmul.f32 0.5, %v842_v5  ;;  %v846_v15 = vadd.f32 %v845_v26, %v2030_v9 }
 0x26a   : > { %1063 = vst [vmem:[%s2045_s12 + $0x28] sm:$0xff] %v1025_v7  ;;  %v1027_v16 = vadd.f32 0.5, %v989_v10  ;;  %1512 = vtanh.f32 %v918_v11  ;;  %v920_v17 = vmul.f32 0.5, %v844_v12 }
 0x26b   : > { %1064 = vst [vmem:[%s2045_s12 + $0x30] sm:$0xff] %v1026_v13  ;;  %1514 = vtanh.f32 %v919_v14  ;;  %v921_v18 = vmul.f32 0.5, %v846_v15 }
 0x26c   : > { %v1505_v19 = vpop.eup %1504  ;;  %1065 = vst [vmem:[%s2045_s12 + $0x38] sm:$0xff] %v1027_v16  ;;  %1516 = vtanh.f32 %v920_v17 }
 0x26d   : > { %v1507_v20 = vpop.eup %1506  ;;  %v990_v21 = vmul.f32 0.5, %v1505_v19  ;;  %1518 = vtanh.f32 %v921_v18  ;;  %v849_v22 = vpop.f32.mrb[16].mxu1 }
 0x26e   : > { %v1509_v23 = vpop.eup %1508  ;;  %v991_v24 = vmul.f32 0.5, %v1507_v20  ;;  %v850_v25 = vadd.f32 %v849_v22, %v2028_v8  ;;  %v851_v27 = vpop.f32.mrb[17].mxu1 }
 0x26f   : > { %v1511_v29 = vpop.eup %1510  ;;  %v1028_v30 = vadd.f32 0.5, %v990_v21  ;;  %v992_v31 = vmul.f32 0.5, %v1509_v23  ;;  %v852_v32 = vadd.f32 %v851_v27, %v2030_v9  ;;  %v853_v33 = vpop.f32.mrb[18].mxu1 }
 0x270   : > { %v1029_v34 = vadd.f32 0.5, %v991_v24  ;;  %v993_v35 = vmul.f32 0.5, %v1511_v29  ;;  %v922_v36 = vmul.f32 0.5, %v850_v25  ;;  %v854_v37 = vadd.f32 %v853_v33, %v2028_v8  ;;  %v855_v38 = vpop.f32.mrb[19].mxu1 }
 0x271   : > { %1066 = vst [vmem:[%s2045_s12 + $0x40] sm:$0xff] %v1028_v30  ;;  %v1030_v39 = vadd.f32 0.5, %v992_v31  ;;  %v923_v40 = vmul.f32 0.5, %v852_v32  ;;  %v856_v41 = vadd.f32 %v855_v38, %v2030_v9 }
 0x272   : > { %1067 = vst [vmem:[%s2045_s12 + $0x48] sm:$0xff] %v1029_v34  ;;  %v1031_v42 = vadd.f32 0.5, %v993_v35  ;;  %1520 = vtanh.f32 %v922_v36  ;;  %v924_v43 = vmul.f32 0.5, %v854_v37 }
 0x273   : > { %1068 = vst [vmem:[%s2045_s12 + $0x50] sm:$0xff] %v1030_v39  ;;  %1522 = vtanh.f32 %v923_v40  ;;  %v925_v44 = vmul.f32 0.5, %v856_v41 }
 0x274   : > { %v1513_v45 = vpop.eup %1512  ;;  %1069 = vst [vmem:[%s2045_s12 + $0x58] sm:$0xff] %v1031_v42  ;;  %1524 = vtanh.f32 %v924_v43 }
 0x275   : > { %v1515_v46 = vpop.eup %1514  ;;  %v994_v47 = vmul.f32 0.5, %v1513_v45  ;;  %1526 = vtanh.f32 %v925_v44  ;;  %v859_v48 = vpop.f32.mrb[20].mxu1 }
 0x276   : > { %v1517_v49 = vpop.eup %1516  ;;  %v995_v50 = vmul.f32 0.5, %v1515_v46  ;;  %v860_v51 = vadd.f32 %v859_v48, %v2028_v8  ;;  %v861_v52 = vpop.f32.mrb[21].mxu1 }
 0x277   : > { %v1519_v53 = vpop.eup %1518  ;;  %v1032_v54 = vadd.f32 0.5, %v994_v47  ;;  %v996_v55 = vmul.f32 0.5, %v1517_v49  ;;  %v862_v56 = vadd.f32 %v861_v52, %v2030_v9  ;;  %v863_v57 = vpop.f32.mrb[22].mxu1 }
 0x278   : > { %v1033_v58 = vadd.f32 0.5, %v995_v50  ;;  %v997_v59 = vmul.f32 0.5, %v1519_v53  ;;  %v926_v60 = vmul.f32 0.5, %v860_v51  ;;  %v864_v61 = vadd.f32 %v863_v57, %v2028_v8  ;;  %v865_v62 = vpop.f32.mrb[23].mxu1 }
 0x279   : > { %1070 = vst [vmem:[%s2045_s12 + $0x60] sm:$0xff] %v1032_v54  ;;  %v1034_v63 = vadd.f32 0.5, %v996_v55  ;;  %v927_v0 = vmul.f32 0.5, %v862_v56  ;;  %v866_v28 = vadd.f32 %v865_v62, %v2030_v9 }
 0x27a   : > { %1071 = vst [vmem:[%s2045_s12 + $0x68] sm:$0xff] %v1033_v58  ;;  %v1035_v1 = vadd.f32 0.5, %v997_v59  ;;  %1528 = vtanh.f32 %v926_v60  ;;  %v928_v2 = vmul.f32 0.5, %v864_v61 }
 0x27b   : > { %1072 = vst [vmem:[%s2045_s12 + $0x70] sm:$0xff] %v1034_v63  ;;  %1530 = vtanh.f32 %v927_v0  ;;  %v929_v3 = vmul.f32 0.5, %v866_v28 }
 0x27c   : > { %v1521_v4 = vpop.eup %1520  ;;  %1073 = vst [vmem:[%s2045_s12 + $0x78] sm:$0xff] %v1035_v1  ;;  %1532 = vtanh.f32 %v928_v2 }
 0x27d   : > { %v1523_v5 = vpop.eup %1522  ;;  %v998_v6 = vmul.f32 0.5, %v1521_v4  ;;  %1534 = vtanh.f32 %v929_v3  ;;  %v869_v7 = vpop.f32.mrb[24].mxu1 }
 0x27e   : > { %v1525_v10 = vpop.eup %1524  ;;  %v999_v11 = vmul.f32 0.5, %v1523_v5  ;;  %v870_v12 = vadd.f32 %v869_v7, %v2028_v8  ;;  %v871_v26 = vpop.f32.mrb[25].mxu1 }
 0x27f   : > { %v1527_v13 = vpop.eup %1526  ;;  %v1036_v14 = vadd.f32 0.5, %v998_v6  ;;  %v1000_v15 = vmul.f32 0.5, %v1525_v10  ;;  %v872_v16 = vadd.f32 %v871_v26, %v2030_v9  ;;  %v873_v17 = vpop.f32.mrb[26].mxu1 }
 0x280   : > { %v1037_v18 = vadd.f32 0.5, %v999_v11  ;;  %v1001_v19 = vmul.f32 0.5, %v1527_v13  ;;  %v930_v20 = vmul.f32 0.5, %v870_v12  ;;  %v874_v21 = vadd.f32 %v873_v17, %v2028_v8  ;;  %v875_v22 = vpop.f32.mrb[27].mxu1 }
 0x281   : > { %1074 = vst [vmem:[%s2045_s12 + $0x80] sm:$0xff] %v1036_v14  ;;  %v1038_v23 = vadd.f32 0.5, %v1000_v15  ;;  %v931_v24 = vmul.f32 0.5, %v872_v16  ;;  %v876_v25 = vadd.f32 %v875_v22, %v2030_v9 }
 0x282   : > { %1075 = vst [vmem:[%s2045_s12 + $0x88] sm:$0xff] %v1037_v18  ;;  %v1039_v27 = vadd.f32 0.5, %v1001_v19  ;;  %1536 = vtanh.f32 %v930_v20  ;;  %v932_v29 = vmul.f32 0.5, %v874_v21 }
 0x283   : > { %1076 = vst [vmem:[%s2045_s12 + $0x90] sm:$0xff] %v1038_v23  ;;  %1538 = vtanh.f32 %v931_v24  ;;  %v933_v30 = vmul.f32 0.5, %v876_v25 }
 0x284   : > { %v1529_v31 = vpop.eup %1528  ;;  %1077 = vst [vmem:[%s2045_s12 + $0x98] sm:$0xff] %v1039_v27  ;;  %1540 = vtanh.f32 %v932_v29 }
 0x285   : > { %v1531_v32 = vpop.eup %1530  ;;  %v1002_v33 = vmul.f32 0.5, %v1529_v31  ;;  %1542 = vtanh.f32 %v933_v30  ;;  %v879_v34 = vpop.f32.mrb[28].mxu1 }
 0x286   : > { %v1533_v35 = vpop.eup %1532  ;;  %v1003_v36 = vmul.f32 0.5, %v1531_v32  ;;  %v880_v37 = vadd.f32 %v879_v34, %v2028_v8  ;;  %v881_v38 = vpop.f32.mrb[29].mxu1 }
 0x287   : > { %v1535_v39 = vpop.eup %1534  ;;  %v1040_v40 = vadd.f32 0.5, %v1002_v33  ;;  %v1004_v41 = vmul.f32 0.5, %v1533_v35  ;;  %v882_v42 = vadd.f32 %v881_v38, %v2030_v9  ;;  %v883_v43 = vpop.f32.mrb[30].mxu1 }
 0x288   : > { %v1041_v44 = vadd.f32 0.5, %v1003_v36  ;;  %v1005_v45 = vmul.f32 0.5, %v1535_v39  ;;  %v934_v46 = vmul.f32 0.5, %v880_v37  ;;  %v884_v47 = vadd.f32 %v883_v43, %v2028_v8  ;;  %v885_v48 = vpop.f32.mrb[31].mxu1 }
 0x289   : > { %1078 = vst [vmem:[%s2045_s12 + $0xa0] sm:$0xff] %v1040_v40  ;;  %v1042_v49 = vadd.f32 0.5, %v1004_v41  ;;  %v935_v50 = vmul.f32 0.5, %v882_v42  ;;  %v886_v51 = vadd.f32 %v885_v48, %v2030_v9 }
 0x28a   : > { %1079 = vst [vmem:[%s2045_s12 + $0xa8] sm:$0xff] %v1041_v44  ;;  %v1043_v52 = vadd.f32 0.5, %v1005_v45  ;;  %1544 = vtanh.f32 %v934_v46  ;;  %v936_v53 = vmul.f32 0.5, %v884_v47 }
 0x28b   : > { %1080 = vst [vmem:[%s2045_s12 + $0xb0] sm:$0xff] %v1042_v49  ;;  %1546 = vtanh.f32 %v935_v50  ;;  %v937_v54 = vmul.f32 0.5, %v886_v51 }
 0x28c   : > { %v1537_v55 = vpop.eup %1536  ;;  %1081 = vst [vmem:[%s2045_s12 + $0xb8] sm:$0xff] %v1043_v52  ;;  %1548 = vtanh.f32 %v936_v53 }
 0x28d   : > { %v1539_v56 = vpop.eup %1538  ;;  %v1006_v57 = vmul.f32 0.5, %v1537_v55  ;;  %1550 = vtanh.f32 %v937_v54  ;;  %v889_v58 = vpop.f32.mrb[32].mxu1 }
 0x28e   : > { %v1541_v59 = vpop.eup %1540  ;;  %v1007_v60 = vmul.f32 0.5, %v1539_v56  ;;  %v890_v61 = vadd.f32 %v889_v58, %v2028_v8  ;;  %v891_v62 = vpop.f32.mrb[33].mxu1 }
 0x28f   : > { %v1543_v63 = vpop.eup %1542  ;;  %v1044_v0 = vadd.f32 0.5, %v1006_v57  ;;  %v1008_v28 = vmul.f32 0.5, %v1541_v59  ;;  %v892_v1 = vadd.f32 %v891_v62, %v2030_v9  ;;  %v893_v2 = vpop.f32.mrb[34].mxu1 }
 0x290   : > { %v1045_v3 = vadd.f32 0.5, %v1007_v60  ;;  %v1009_v4 = vmul.f32 0.5, %v1543_v63  ;;  %v938_v5 = vmul.f32 0.5, %v890_v61  ;;  %v894_v6 = vadd.f32 %v893_v2, %v2028_v8  ;;  %v895_v7 = vpop.f32.mrb[35].mxu1 }
 0x291   : > { %1082 = vst [vmem:[%s2045_s12 + $0xc0] sm:$0xff] %v1044_v0  ;;  %v1046_v10 = vadd.f32 0.5, %v1008_v28  ;;  %v939_v11 = vmul.f32 0.5, %v892_v1  ;;  %v896_v12 = vadd.f32 %v895_v7, %v2030_v9 }
 0x292   : > { %1083 = vst [vmem:[%s2045_s12 + $0xc8] sm:$0xff] %v1045_v3  ;;  %v1047_v26 = vadd.f32 0.5, %v1009_v4  ;;  %1552 = vtanh.f32 %v938_v5  ;;  %v940_v13 = vmul.f32 0.5, %v894_v6 }
 0x293   : > { %1084 = vst [vmem:[%s2045_s12 + $0xd0] sm:$0xff] %v1046_v10  ;;  %1554 = vtanh.f32 %v939_v11  ;;  %v941_v14 = vmul.f32 0.5, %v896_v12 }
 0x294   : > { %v1545_v15 = vpop.eup %1544  ;;  %1085 = vst [vmem:[%s2045_s12 + $0xd8] sm:$0xff] %v1047_v26  ;;  %1556 = vtanh.f32 %v940_v13 }
 0x295   : > { %v1547_v16 = vpop.eup %1546  ;;  %v1010_v17 = vmul.f32 0.5, %v1545_v15  ;;  %1558 = vtanh.f32 %v941_v14  ;;  %v899_v18 = vpop.f32.mrb[36].mxu1 }
 0x296   : > { %v1549_v19 = vpop.eup %1548  ;;  %v1011_v20 = vmul.f32 0.5, %v1547_v16  ;;  %v900_v21 = vadd.f32 %v899_v18, %v2028_v8  ;;  %v901_v22 = vpop.f32.mrb[37].mxu1 }
 0x297   : > { %v1551_v23 = vpop.eup %1550  ;;  %v1048_v24 = vadd.f32 0.5, %v1010_v17  ;;  %v1012_v25 = vmul.f32 0.5, %v1549_v19  ;;  %v902_v27 = vadd.f32 %v901_v22, %v2030_v9  ;;  %v903_v29 = vpop.f32.mrb[38].mxu1 }
 0x298   : > { %v1049_v30 = vadd.f32 0.5, %v1011_v20  ;;  %v1013_v31 = vmul.f32 0.5, %v1551_v23  ;;  %v942_v32 = vmul.f32 0.5, %v900_v21  ;;  %v904_v33 = vpop.f32.mrb[39].mxu1 }
 0x299   : > { %1086 = vst [vmem:[%s2045_s12 + $0xe0] sm:$0xff] %v1048_v24  ;;  %v1050_v34 = vadd.f32 0.5, %v1012_v25  ;;  %v943_v35 = vmul.f32 0.5, %v902_v27 }
 0x29a   : > { %1087 = vst [vmem:[%s2045_s12 + $0xe8] sm:$0xff] %v1049_v30  ;;  %v1051_v36 = vadd.f32 0.5, %v1013_v31  ;;  %1560 = vtanh.f32 %v942_v32 }
 0x29b   : > { %1088 = vst [vmem:[%s2045_s12 + $0xf0] sm:$0xff] %v1050_v34  ;;  %1562 = vtanh.f32 %v943_v35 }
 0x29c   : > { %v1553_v8 = vpop.eup %1552  ;;  %1089 = vst [vmem:[%s2045_s12 + $0xf8] sm:$0xff] %v1051_v36 }
 0x29d   : > { %v1555_v9 = vpop.eup %1554  ;;  %v1014_v37 = vmul.f32 0.5, %v1553_v8 }
 0x29e   : > { %v1557_v38 = vpop.eup %1556  ;;  %v1015_v39 = vmul.f32 0.5, %v1555_v9 }
 0x29f   : > { %v1559_v40 = vpop.eup %1558  ;;  %v1052_v41 = vadd.f32 0.5, %v1014_v37  ;;  %v1016_v42 = vmul.f32 0.5, %v1557_v38 }
 0x2a0   : > { %v1053_v43 = vadd.f32 0.5, %v1015_v39  ;;  %v1017_v44 = vmul.f32 0.5, %v1559_v40 }
 0x2a1   : > { %1090 = vst [vmem:[%s2045_s12 + $0x100] sm:$0xff] %v1052_v41  ;;  %v1054_v45 = vadd.f32 0.5, %v1016_v42 }
 0x2a2   : > { %1091 = vst [vmem:[%s2045_s12 + $0x108] sm:$0xff] %v1053_v43  ;;  %v1055_v46 = vadd.f32 0.5, %v1017_v44 }
 0x2a3   : > { %1092 = vst [vmem:[%s2045_s12 + $0x110] sm:$0xff] %v1054_v45 }
 0x2a4   : > { %v1561_v47 = vpop.eup %1560  ;;  %1093 = vst [vmem:[%s2045_s12 + $0x118] sm:$0xff] %v1055_v46 }
 0x2a5   : > { %v1563_v48 = vpop.eup %1562  ;;  %v1018_v49 = vmul.f32 0.5, %v1561_v47 }
 0x2a6   : > { %v1019_v50 = vmul.f32 0.5, %v1563_v48 }
 0x2a7   : > { %v1056_v51 = vadd.f32 0.5, %v1018_v49 }
 0x2a8   : > { %v1057_v52 = vadd.f32 0.5, %v1019_v50 }
 0x2a9   : > { %1094 = vst [vmem:[%s2045_s12 + $0x120] sm:$0xff] %v1056_v51 }
 0x2aa   : > { %1095 = vst [vmem:[%s2045_s12 + $0x128] sm:$0xff] %v1057_v52 }
 0x2ab   : > { %1663 = shalt.err (!%p1660_p2)
}
 0x2ac   : > { %s1664_s9 = scalar_lea.hbm %s2115_s28, 4864  ;;  %s1668_s8 = scalar_lea.hbm %s2168_s5, 9728 }
 0x2ad   : > { %p1665_p13 = scmp.ne.s32.totalorder %s2115_s28, %s1664_s9  ;;  %p1669_p4 = scmp.lt.u32.totalorder %s2115_s28, %s2168_s5 }
 0x2ae   : > { %p1670_p7 = scmp.lt.u32.totalorder %s1668_s8, %s1664_s9  ;;  %p1672_p11 = scmp.lt.u32.totalorder %s1664_s9, %s2115_s28 }
 0x2af   : > { %p1666_p6 = pnand %p1665_p13, %p2182_p0 }
 0x2b0   : > { %p1671_p8 = por %p1670_p7, %p1669_p4 }
 0x2b1   : > { %p1667_p10 = pneg %p1666_p6 }
 0x2b2   : > { %p1673_p1 = por %p1672_p11, %p1671_p8 }
 0x2b4   : > { %p1674_p3 = pnand %p1673_p1, %p1667_p10 }
 0x2b6   : > { %1677 = shalt.err (!%p1674_p3)
}
 0x2b7   : > { %s1733_s13 = smov 256   ;;  %s1734_s7 = smov 16  }
 0x2b8   : > { %1344 = dma.vmem_to_hbm [thread:$0]  (%p2182_p0), %s2117_s29, 4864, %s2115_s28, %s1097_s22, %s1733_s13, %s1733_s13, %s1734_s7  }
 0x2b9 PF: > { %s1126_s10 = sand.u32 1, %s1708_s18   ;;  %p2183_p5 = scmp.ne.s32.totalorder %s2173_s25, 0 }
 0x2ba   : > { %p2184_p9 = scmp.ge.s32.totalorder %s1720_s21, 2  ;;  %s1127_s14 = scalar_lea.sflag [#allocation4], %s1126_s10 }
 0x2bc   : > { %p1358_p12 = pnand %p2184_p9, %p2183_p5 }
 0x2be   : > { %1703 = dma.done.wait (!%p1358_p12), %s1127_s14, 4864  }
 0x2bf   : > { %1705 = vsyncadd (!%p1358_p12), %s1127_s14, 4294962432  ;;  %p19_p2 = scmp.ge.s32.totalorder %s1875_s16, 4   ;;  %s2185_s18 = smov %s1712_s19 }
 0x2c0   : > { %s2186_s19 = smov %s1716_s20  ;;  %s2187_s20 = smov %s1884_s27 }
 0x2c1   : > { %s2188_s21 = smov %s1875_s16  ;;  %21 = sbr.rel (!%p19_p2) target bundleno = 6 (0x6), region = 93 }
 0x2c8   :  { %1132 = vsyncpa [#allocation3], 1 }
 0x2c9   :  { %1134 = vsyncpa [#allocation3 + $0x1], 1 }
 0x2ca   :  { %1135 = vsyncpa [#allocation6], 1 }
 0x2cb   :  { %1136 = vsyncpa [#allocation4], 1 }
 0x2cc   :  { %1138 = vsyncpa [#allocation4 + $0x1], 1 }

</bundles_post_ra>
